<compile_context>
chip_gen: v6e
topology: v6e:2x2x1
jax: 0.10.0
libtpu: 0.0.40
codegen_flags: <defaults>
</compile_context>

<pallas_src>
import functools
import math

import numpy as np
import jax
import jax.numpy as jnp
from jax.experimental import pallas as pl
from jax.experimental.pallas import tpu as pltpu


# ----------------------------- constant-matrix setup -----------------------------

def _bilinear_kernel_1d(stride: int) -> np.ndarray:
    k = np.arange(1, 2 * stride + 1, 2, dtype=np.float64)
    k = np.concatenate((k, k[::-1]))
    return k / k.sum()


def _downsample_matrix(l_pad: int, l_out: int, kernel: np.ndarray, stride: int) -> np.ndarray:
    """M[l_pad, l_out] with M[i*stride + k, i] = kernel[k]  (valid conv + stride)."""
    K = kernel.shape[0]
    M = np.zeros((l_pad, l_out), dtype=np.float64)
    for i in range(l_out):
        M[i * stride:i * stride + K, i] = kernel
    return M


def _reflect_indices(L: int, p: int) -> np.ndarray:
    """ReflectionPad1d(p) gather indices: padded position -> original position."""
    idx = np.arange(L + 2 * p) - p
    idx = np.abs(idx)                                    # left reflection (no edge repeat)
    idx = np.where(idx > L - 1, 2 * (L - 1) - idx, idx)  # right reflection
    return idx


def _folded_downsample_matrix(L: int, stride: int):
    """(L, L_out) matrix D s.t. x @ D == conv1d(reflection_pad(x, s//2), triangle, s)."""
    p = stride // 2
    K = 2 * stride
    kern = _bilinear_kernel_1d(stride)
    L_pad = L + 2 * p
    L_out = (L_pad - K) // stride + 1
    D_full = _downsample_matrix(L_pad, L_out, kern, stride)   # (L_pad, L_out)
    refl = _reflect_indices(L, p)                             # (L_pad,)
    D_fold = np.zeros((L, L_out), dtype=np.float64)
    np.add.at(D_fold, refl, D_full)                           # fold pad: D_fold = S @ D_full
    return D_fold.astype(np.float32), L_out


# ----------------------------------- kernel -----------------------------------

def _downsample_kernel(x_ref, dw_ref, dht_ref, o_ref, *, nchw_out: bool):
    # x_ref  : (B, H, W)            input images (f32 or bf16)
    # dw_ref : (W, W_out)           f32 pad-folded horizontal downsample matrix
    # dht_ref: (H_out, H)           f32 pad-folded vertical matrix, PRE-transposed
    # o_ref  : (1, H_out, B*W_out)  lane-dense slab   OR   (B, H_out, W_out) NCHW block
    B, H, W = x_ref.shape
    W_out = dw_ref.shape[1]
    H_out = dht_ref.shape[0]

    # Horizontal pass: one MXU matmul with M = B*H (f32 operands, f32 accumulation).
    x = x_ref[...].astype(jnp.float32).reshape(B * H, W)
    t = jnp.dot(x, dw_ref[...], preferred_element_type=jnp.float32)     # (B*H, W_out)

    # Single leading-axis relayout (minor dim W_out untouched), then the vertical pass
    # is one matmul whose result is already in output layout (no trailing transpose).
    t = t.reshape(B, H, W_out).transpose(1, 0, 2).reshape(H, B * W_out)  # (H, B*W_out)
    r = jnp.dot(dht_ref[...], t, preferred_element_type=jnp.float32)    # (H_out, B*W_out)

    if nchw_out:
        # (H_out, B, W_out) -> (B, H_out, W_out): leading relayout, minor dim intact.
        o_ref[...] = r.reshape(H_out, B, W_out).transpose(1, 0, 2).astype(o_ref.dtype)
    else:
        o_ref[0] = r.astype(o_ref.dtype)                                 # lane-dense store


# ------------------------------ block / VMEM sizing ------------------------------

def _round_up(x: int, m: int) -> int:
    return ((x + m - 1) // m) * m


def _vmem_limit_bytes() -> int:
    """~96 MiB on v5e/v6e (128 MiB physical), ~48 MiB on v7x (64 MiB physical)."""
    try:
        cap = int(pltpu.get_tpu_info().vmem_capacity_bytes)
    except Exception:
        cap = 64 * 1024 * 1024        # conservative fallback, safe on every generation
    return max(32 * 1024 * 1024, min(cap * 3 // 4, 96 * 1024 * 1024))


def _choose_block_images(NC, H, W, W_out, H_out, itemsize, vmem_limit, nchw_out) -> int:
    """Images per grid step, sized from the VMEM budget (dominant lever for a
    memory-bound kernel), keeping stores lane-dense and >=2 grid blocks when possible."""
    align = 8                                             # sublane alignment
    if not nchw_out:
        # Slab layout: keep B_BLK * W_out a multiple of 128 -> unmasked lane-dense vst.
        align = math.lcm(8, 128 // math.gcd(W_out, 128))
    # Approximate per-image VMEM inside one grid step:
    #   double-buffered input + f32 working copy + two pass temporaries + result
    #   + double-buffered output block.
    per_image = (H * W * (2 * itemsize + 4)
                 + 2 * H * W_out * 4
                 + H_out * W_out * 4
                 + 2 * H_out * W_out * itemsize)
    budget = vmem_limit // 2                              # headroom for compiler scratch
    b = max(align, (budget // per_image) // align * align)
    nc_align = _round_up(NC, align)
    b = min(b, nc_align)
    # Prefer at least two grid blocks (v7x has 2 TensorCores) when NC allows it.
    if b >= nc_align and nc_align >= 2 * align:
        b = max(align, (nc_align // 2) // align * align)
    return b


# ----------------------------------- wrapper -----------------------------------

def bilinear_downsample(x: jax.Array, stride: int) -> jax.Array:
    """x: (N, C, H, W) float32/bfloat16 -> (N, C, H_out, W_out).  Matches the PyTorch
    BilinearDownsample module (reflection pad + separable triangle filter + stride)."""
    N, C, H, W = x.shape
    NC = N * C
    itemsize = jnp.dtype(x.dtype).itemsize

    Dw_np, W_out = _folded_downsample_matrix(W, stride)       # (W, W_out)
    Dh_np, H_out = _folded_downsample_matrix(H, stride)       # (H, H_out)
    Dw = jnp.asarray(Dw_np)                                    # f32
    DhT = jnp.asarray(np.ascontiguousarray(Dh_np.T))           # (H_out, H) f32, pre-transposed

    vmem_limit = _vmem_limit_bytes()
    nchw_out = (W_out >= 128) and (W_out % 128 == 0)
    B_BLK = _choose_block_images(NC, H, W, W_out, H_out, itemsize, vmem_limit, nchw_out)
    num_blocks = (NC + B_BLK - 1) // B_BLK
    NC_pad = num_blocks * B_BLK

    xb = x.reshape(NC, H, W)
    if NC_pad != NC:
        xb = jnp.pad(xb, ((0, NC_pad - NC), (0, 0), (0, 0)))

    kernel = functools.partial(_downsample_kernel, nchw_out=nchw_out)

    cost = pl.CostEstimate(
        flops=2 * NC_pad * H * W_out * (W + H_out),
        transcendentals=0,
        bytes_accessed=(NC_pad * (H * W + H_out * W_out)) * itemsize
                       + (W * W_out + H * H_out) * 4,
    )

    if nchw_out:
        out_shape = jax.ShapeDtypeStruct((NC_pad, H_out, W_out), x.dtype)
        out_specs = pl.BlockSpec((B_BLK, H_out, W_out), lambda b: (b, 0, 0))
    else:
        out_shape = jax.ShapeDtypeStruct((num_blocks, H_out, B_BLK * W_out), x.dtype)
        out_specs = pl.BlockSpec((1, H_out, B_BLK * W_out), lambda b: (b, 0, 0))

    out = pl.pallas_call(
        kernel,
        out_shape=out_shape,
        grid_spec=pltpu.PrefetchScalarGridSpec(
            num_scalar_prefetch=0,
            grid=(num_blocks,),
            in_specs=[
                pl.BlockSpec((B_BLK, H, W), lambda b: (b, 0, 0)),
                pl.BlockSpec((W, W_out), lambda b: (0, 0)),
                pl.BlockSpec((H_out, H), lambda b: (0, 0)),
            ],
            out_specs=out_specs,
        ),
        compiler_params=pltpu.CompilerParams(
            dimension_semantics=("parallel",),     # grid shards across v7x's 2 TCs
            vmem_limit_bytes=vmem_limit,
        ),
        cost_estimate=cost,
    )(xb, Dw, DhT)

    if not nchw_out:
        # Un-permute the (small, already-downsampled) slab back to per-image layout.
        out = out.reshape(num_blocks, H_out, B_BLK, W_out)
        out = out.transpose(0, 2, 1, 3).reshape(NC_pad, H_out, W_out)
    return out[:NC].reshape(N, C, H_out, W_out)


# ------------------------------------- test -------------------------------------

if __name__ == "__main__":
    key = jax.random.PRNGKey(0)
    N, C, H, W = 2, 4, 16, 16
    stride = 2

    x = jax.random.normal(key, (N, C, H, W), dtype=jnp.float32)

    y = jax.block_until_ready(bilinear_downsample(x, stride))
    assert y.shape == (N, C, H // stride, W // stride), y.shape

    # Reference: float64, explicit reflection pad + full (unfolded) downsample matrices
    # (independent of the pad-folding used in the kernel).
    p = stride // 2
    K = 2 * stride
    kern = _bilinear_kernel_1d(stride)
    xp = np.pad(np.asarray(x, dtype=np.float64),
                ((0, 0), (0, 0), (p, p), (p, p)), mode="reflect")
    H_pad, W_pad = H + 2 * p, W + 2 * p
    W_out = (W_pad - K) // stride + 1
    H_out = (H_pad - K) // stride + 1
    Dw_ref = _downsample_matrix(W_pad, W_out, kern, stride)
    Dh_ref = _downsample_matrix(H_pad, H_out, kern, stride)
    ref = np.einsum("nchw,wj,hi->ncij", xp, Dw_ref, Dh_ref)

    # f32 data / f32 accumulation; tolerance covers TPU MXU default-precision passes.
    np.testing.assert_allclose(np.asarray(y), ref, rtol=2e-2, atol=2e-2)

    print("KERNEL_OK")
</pallas_src>

<mosaic_0001>
module attributes {stable_mosaic.version = 11 : i64} {
  func.func @_downsample_kernel(%arg0: i32, %arg1: memref<16x16x16xf32, #tpu.memory_space<vmem>>, %arg2: memref<16x8xf32, #tpu.memory_space<vmem>>, %arg3: memref<8x16xf32, #tpu.memory_space<vmem>>, %arg4: memref<1x8x128xf32, #tpu.memory_space<vmem>>) attributes {dimension_semantics = [#tpu.dimension_semantics<parallel>], iteration_bounds = array<i64: 1>, scalar_prefetch = 0 : i64, scratch_operands = 0 : i64, tpu.core_type = #tpu.core_type<tc>, window_params = [{transform_indices = @transform_0, window_bounds = array<i64: 16, 16, 16>}, {pipeline_mode = #tpu.pipeline_mode<synchronous>, transform_indices = @transform_1, window_bounds = array<i64: 16, 8>}, {pipeline_mode = #tpu.pipeline_mode<synchronous>, transform_indices = @transform_2, window_bounds = array<i64: 8, 16>}, {transform_indices = @transform_3, window_bounds = array<i64: 1, 8, 128>}]} {
    %c0 = arith.constant 0 : index
    %c0_0 = arith.constant 0 : index
    %c0_1 = arith.constant 0 : index
    %0 = vector.load %arg1[%c0, %c0_0, %c0_1] : memref<16x16x16xf32, #tpu.memory_space<vmem>>, vector<16x16x16xf32>
    %1 = vector.shape_cast %0 : vector<16x16x16xf32> to vector<256x16xf32>
    %c0_2 = arith.constant 0 : index
    %c0_3 = arith.constant 0 : index
    %2 = vector.load %arg2[%c0_2, %c0_3] : memref<16x8xf32, #tpu.memory_space<vmem>>, vector<16x8xf32>
    %cst = arith.constant dense<0.000000e+00> : vector<256x8xf32>
    %3 = tpu.matmul %1, %2, %cst {dimension_numbers = #tpu.dot_dimension_numbers<[1], [0], [0], [1], [0, 0, 1, 1], [], []>} : vector<256x16xf32>, vector<16x8xf32>, vector<256x8xf32> -> vector<256x8xf32>
    %4 = vector.shape_cast %3 : vector<256x8xf32> to vector<16x16x8xf32>
    %5 = tpu.transpose %4, [1, 0, 2] : vector<16x16x8xf32> -> vector<16x16x8xf32>
    %6 = vector.shape_cast %5 : vector<16x16x8xf32> to vector<16x128xf32>
    %c0_4 = arith.constant 0 : index
    %c0_5 = arith.constant 0 : index
    %7 = vector.load %arg3[%c0_4, %c0_5] : memref<8x16xf32, #tpu.memory_space<vmem>>, vector<8x16xf32>
    %cst_6 = arith.constant dense<0.000000e+00> : vector<8x128xf32>
    %8 = tpu.matmul %7, %6, %cst_6 {dimension_numbers = #tpu.dot_dimension_numbers<[1], [0], [0], [1], [0, 0, 1, 1], [], []>} : vector<8x16xf32>, vector<16x128xf32>, vector<8x128xf32> -> vector<8x128xf32>
    %c0_7 = arith.constant 0 : index
    %c0_8 = arith.constant 0 : index
    %c0_9 = arith.constant 0 : index
    %9 = vector.load %arg4[%c0_7, %c0_8, %c0_9] : memref<1x8x128xf32, #tpu.memory_space<vmem>>, vector<1x8x128xf32>
    %10 = vector.shape_cast %9 : vector<1x8x128xf32> to vector<8x128xf32>
    %11 = vector.shape_cast %8 : vector<8x128xf32> to vector<1x8x128xf32>
    tpu.vector_store %arg4[%c0_7, %c0_8, %c0_9], %11 {strides = array<i32>} : memref<1x8x128xf32, #tpu.memory_space<vmem>>, vector<1x8x128xf32>,
    return
  }
  func.func @transform_0(%arg0: i32) -> (i32, i32, i32) {
    %c0_i32 = arith.constant 0 : i32
    %c0_i32_0 = arith.constant 0 : i32
    %c0_i32_1 = arith.constant 0 : i32
    return %arg0, %c0_i32, %c0_i32_0 : i32, i32, i32
  }
  func.func @transform_1(%arg0: i32) -> (i32, i32) {
    %c0_i32 = arith.constant 0 : i32
    %c0_i32_0 = arith.constant 0 : i32
    %c0_i32_1 = arith.constant 0 : i32
    return %c0_i32, %c0_i32_0 : i32, i32
  }
  func.func @transform_2(%arg0: i32) -> (i32, i32) {
    %c0_i32 = arith.constant 0 : i32
    %c0_i32_0 = arith.constant 0 : i32
    %c0_i32_1 = arith.constant 0 : i32
    return %c0_i32, %c0_i32_0 : i32, i32
  }
  func.func @transform_3(%arg0: i32) -> (i32, i32, i32) {
    %c0_i32 = arith.constant 0 : i32
    %c0_i32_0 = arith.constant 0 : i32
    %c0_i32_1 = arith.constant 0 : i32
    return %arg0, %c0_i32, %c0_i32_0 : i32, i32, i32
  }
}

</mosaic_0001>

<bundles_post_ra>
// kernel: tpu_custom_call.1
= control target key start
LH: loop header
LB: loop body
LE: loop exit
PB: predicated region body
PF: predicated region fallthrough
CT: control target
= control target key end

     0   :  { %8 = vsyncpa [#allocation3], 0  ;;  %s2403_s0 = inlined_call_operand.hbm [shape: f32[16,16,16], index: 0, kind: input, shape index: {}]   ;;  %s2404_s1 = inlined_call_operand.vmem [shape: f32[16,8], index: 1, kind: input, shape index: {}]   ;;  %s2405_s2 = inlined_call_operand.vmem [shape: f32[8,16], index: 2, kind: input, shape index: {}]   ;;  %s2406_s3 = inlined_call_operand.hbm [shape: f32[1,8,128], index: 3, kind: output, shape index: {}]  }
   0x1   :  { %9 = vsyncpa [#allocation4], 0  ;;  %s1958_s12 = smov [#allocation2]  }
   0x2   :  { %s15_s13 = sshll.u32 %s1958_s12, 4  ;;  %s16_s13 = int_to_ptr.vmem [resolvable:$true] %s15_s13 }
   0x3   :  { %s1922_s14 = scalar_lea.vmem %s16_s13, 4096  ;;  %p1927_p1 = scmp.lt.s32.totalorder %s16_s13, %s16_s13 }
   0x4   :  { %p1923_p0 = scmp.ne.s32.totalorder %s16_s13, %s1922_s14  ;;  %p1928_p2 = scmp.lt.s32.totalorder %s1922_s14, %s1922_s14 }
   0x6   :  { %p1929_p3 = por %p1928_p2, %p1927_p1 }
   0x8   :  { %p1930_p4 = pnand %p1929_p3, %p1923_p0 }
   0xa   :  { %1933 = shalt.err (!%p1930_p4)
}
   0xb   :  { %s1959_s15 = smov 128   ;;  %s1960_s16 = smov 8  }
   0xc   :  { %21 = dma.hbm_to_vmem [thread:$0]  %s2403_s0, 4096, %s16_s13, [#allocation3], %s1959_s15, %s1959_s15, %s1960_s16  }
   0xd   :  { %1954 = dma.done.wait [#allocation3], 4096  }
   0xe   :  { %1955 = vsyncadd [#allocation3], 4294963200  ;;  %v62_v0 = vld [vmem:[%s2404_s1 + $0x8] sm:$0xff]  ;;  %v61_v1 = vld [vmem:[%s2404_s1] sm:$0xff]  ;;  %vm63_vm0 = vcmask 130048   ;;  %v390_v44 = vlaneseq  ;;  %s1963_s0 = smov 24  }
   0xf   :  { %1829 = vmatprep.subr.mxu0 %v62_v0  ;;  %1888 = vmatprep.subr.mxu1 %v62_v0  ;;  %v29_v2 = vld [vmem:[#allocation2] sm:$0xff]  ;;  %v47_v3 = vld [vmem:[#allocation2 + $0x90] sm:$0xff]  ;;  %v30_v4 = vld [vmem:[#allocation2 + $0x8] sm:$0xff]  ;;  %v1961_v42 = vmov 1983009808   ;;  %s1964_s1 = smov 16  }
  0x10   :  { %1830 = vmatpush3.msra.mxu0 %v62_v0  ;;  %1890 = vmatpush3.msra.mxu1 %v62_v0  ;;  %v48_v5 = vld [vmem:[#allocation2 + $0x98] sm:$0xff]  ;;  %v31_v6 = vld [vmem:[#allocation2 + $0x10] sm:$0xff]  ;;  %v49_v7 = vld [vmem:[#allocation2 + $0xa0] sm:$0xff]  ;;  %v388_v43 = vunpack.c.l.s4 %v1961_v42  ;;  %v391_v48 = vshrl.u32 %v390_v44, 7  ;;  %v1962_v52 = vmov 1934713408  }
  0x11   :  { %1831 = vmatprep.subr.mxu0 %v61_v1  ;;  %1889 = vmatprep.subr.mxu1 %v61_v1  ;;  %v32_v8 = vld [vmem:[#allocation2 + $0x18] sm:$0xff]  ;;  %v50_v9 = vld [vmem:[#allocation2 + $0xa8] sm:$0xff]  ;;  %v33_v10 = vld [vmem:[#allocation2 + $0x20] sm:$0xff]  ;;  %v452_v53 = vunpack.c.l.s4 %v1962_v52  ;;  %s1965_s23 = smov 96   ;;  %s1966_s24 = smov 104   ;;  %vm1976_vm1 = vmmov 0  }
  0x12   :  { %1832 = vmatpush3.msra.mxu0 %v61_v1  ;;  %1891 = vmatpush3.msra.mxu1 %v61_v1  ;;  %v51_v11 = vld [vmem:[#allocation2 + $0xb0] sm:$0xff]  ;;  %v34_v12 = vld [vmem:[#allocation2 + $0x28] sm:$0xff]  ;;  %v52_v13 = vld [vmem:[#allocation2 + $0xb8] sm:$0xff]  ;;  %v389_v47 = vunpack.c.0.s8 %v388_v43  ;;  %s1967_s25 = smov 112   ;;  %s1968_s26 = smov 32   ;;  %vm1593_vm2 = vcmask 64512  }
  0x13   :  { %1833 = vmatprep.mubr.msk.f32.mxu0 %vm63_vm0, %v29_v2  ;;  %1860 = vmatprep.mubr.msk.f32.mxu1 %vm63_vm0, %v47_v3  ;;  %v35_v14 = vld [vmem:[#allocation2 + $0x30] sm:$0xff]  ;;  %v53_v15 = vld [vmem:[#allocation2 + $0xc0] sm:$0xff]  ;;  %v36_v16 = vld [vmem:[#allocation2 + $0x38] sm:$0xff]  ;;  %v453_v61 = vunpack.c.0.s8 %v452_v53  ;;  %s1969_s27 = smov 40   ;;  %s1970_s28 = smov 48   ;;  %vm1598_vm3 = vcmask 195584  }
  0x14   :  { %1834 = vmatmul.mubr.msk.f32.vlgmr.msra.gmra.mxu0 %vm63_vm0, %v30_v4  ;;  %1861 = vmatmul.mubr.msk.f32.vlgmr.msra.gmra.mxu1 %vm63_vm0, %v48_v5  ;;  %v54_v17 = vld [vmem:[#allocation2 + $0xc8] sm:$0xff]  ;;  %v37_v18 = vld [vmem:[#allocation2 + $0x40] sm:$0xff]  ;;  %v55_v19 = vld [vmem:[#allocation2 + $0xd0] sm:$0xff]  ;;  %v2052_v56 = vsub.s32 %v389_v47, %v391_v48  ;;  %s1971_s29 = smov 56   ;;  %s1972_s30 = smov 64   ;;  %vm1601_vm4 = vcmask 261120  }
  0x15   :  { %1836 = vmatprep.mubr.msk.f32.mxu0 %vm63_vm0, %v31_v6  ;;  %1863 = vmatprep.mubr.msk.f32.mxu1 %vm63_vm0, %v49_v7  ;;  %v38_v20 = vld [vmem:[#allocation2 + $0x48] sm:$0xff]  ;;  %v56_v21 = vld [vmem:[#allocation2 + $0xd8] sm:$0xff]  ;;  %v39_v22 = vld [vmem:[#allocation2 + $0x50] sm:$0xff]  ;;  %s1973_s4 = smov 72   ;;  %s1975_s5 = smov 80   ;;  %vm1604_vm5 = vcmask 326656  }
  0x16   :  { %v57_v23 = vld [vmem:[#allocation2 + $0xe0] sm:$0xff]  ;;  %v40_v24 = vld [vmem:[#allocation2 + $0x58] sm:$0xff]  ;;  %v58_v25 = vld [vmem:[#allocation2 + $0xe8] sm:$0xff]  ;;  %s1977_s6 = smov 88   ;;  %s1978_s7 = smov 120   ;;  %vm1607_vm6 = vcmask 392192  }
  0x17   :  { %v41_v26 = vld [vmem:[#allocation2 + $0x60] sm:$0xff]  ;;  %v59_v27 = vld [vmem:[#allocation2 + $0xf0] sm:$0xff]  ;;  %v42_v28 = vld [vmem:[#allocation2 + $0x68] sm:$0xff]  ;;  %vm1610_vm7 = vcmask 457728   ;;  %vm1613_vm8 = vcmask 523264   ;;  %vm1616_vm9 = vcmask 588800  }
  0x18   :  { %1837 = vmatmul.mubr.msk.f32.gmra.mxu0 %vm63_vm0, %v32_v8  ;;  %1864 = vmatmul.mubr.msk.f32.gmra.mxu1 %vm63_vm0, %v50_v9  ;;  %v60_v29 = vld [vmem:[#allocation2 + $0xf8] sm:$0xff]  ;;  %v43_v30 = vld [vmem:[#allocation2 + $0x70] sm:$0xff]  ;;  %v45_v32 = vld [vmem:[#allocation2 + $0x80] sm:$0xff]  ;;  %vm1619_vm10 = vcmask 654336   ;;  %vm1622_vm11 = vcmask 719872   ;;  %vm1625_vm12 = vcmask 785408  }
  0x19   :  { %1839 = vmatprep.mubr.msk.f32.mxu0 %vm63_vm0, %v33_v10  ;;  %1866 = vmatprep.mubr.msk.f32.mxu1 %vm63_vm0, %v51_v11  ;;  %v44_v31 = vld [vmem:[#allocation2 + $0x78] sm:$0xff]  ;;  %v46_v33 = vld [vmem:[#allocation2 + $0x88] sm:$0xff]  ;;  %v2065_v10 = vsub.s32 %v453_v61, %v391_v48  ;;  %vm1628_vm13 = vcmask 850944   ;;  %vm1631_vm14 = vcmask 916480   ;;  %vm1634_vm15 = vcmask 982016   ;;  %s1979_s10 = smov [#allocation5]  }
  0x1a   :  { %s1718_s11 = sshll.u32 %s1979_s10, 4  ;;  %s1719_s11 = int_to_ptr.vmem [resolvable:$true] %s1718_s11 }
  0x1b   :  { %s1934_s12 = scalar_lea.vmem %s1719_s11, 128  ;;  %p1939_p6 = scmp.lt.s32.totalorder %s1719_s11, %s1719_s11 }
  0x1c   :  { %1840 = vmatmul.mubr.msk.f32.gmra.mxu0 %vm63_vm0, %v34_v12  ;;  %1867 = vmatmul.mubr.msk.f32.gmra.mxu1 %vm63_vm0, %v52_v13  ;;  %p1935_p5 = scmp.ne.s32.totalorder %s1719_s11, %s1934_s12  ;;  %p1940_p7 = scmp.lt.s32.totalorder %s1934_s12, %s1934_s12 }
  0x1d   :  { %1842 = vmatprep.mubr.msk.f32.mxu0 %vm63_vm0, %v35_v14  ;;  %1869 = vmatprep.mubr.msk.f32.mxu1 %vm63_vm0, %v53_v15 }
  0x1e   :  { %p1941_p8 = por %p1940_p7, %p1939_p6 }
  0x20   :  { %1843 = vmatmul.mubr.msk.f32.gmra.mxu0 %vm63_vm0, %v36_v16  ;;  %1870 = vmatmul.mubr.msk.f32.gmra.mxu1 %vm63_vm0, %v54_v17  ;;  %p1942_p9 = pnand %p1941_p8, %p1935_p5 }
  0x21   :  { %1845 = vmatprep.mubr.msk.f32.mxu0 %vm63_vm0, %v37_v18  ;;  %1872 = vmatprep.mubr.msk.f32.mxu1 %vm63_vm0, %v55_v19 }
  0x24   :  { %1846 = vmatmul.mubr.msk.f32.gmra.mxu0 %vm63_vm0, %v38_v20  ;;  %1873 = vmatmul.mubr.msk.f32.gmra.mxu1 %vm63_vm0, %v56_v21 }
  0x25   :  { %1848 = vmatprep.mubr.msk.f32.mxu0 %vm63_vm0, %v39_v22  ;;  %1875 = vmatprep.mubr.msk.f32.mxu1 %vm63_vm0, %v57_v23 }
  0x28   :  { %1849 = vmatmul.mubr.msk.f32.gmra.mxu0 %vm63_vm0, %v40_v24  ;;  %1876 = vmatmul.mubr.msk.f32.gmra.mxu1 %vm63_vm0, %v58_v25 }
  0x29   :  { %1851 = vmatprep.mubr.msk.f32.mxu0 %vm63_vm0, %v41_v26  ;;  %1878 = vmatprep.mubr.msk.f32.mxu1 %vm63_vm0, %v59_v27 }
  0x2c   :  { %1852 = vmatmul.mubr.msk.f32.gmra.mxu0 %vm63_vm0, %v42_v28  ;;  %1879 = vmatmul.mubr.msk.f32.gmra.mxu1 %vm63_vm0, %v60_v29 }
  0x2d   :  { %1854 = vmatprep.mubr.msk.f32.mxu0 %vm63_vm0, %v43_v30 }
  0x30   :  { %1855 = vmatmul.mubr.msk.f32.gmra.mxu0 %vm63_vm0, %v44_v31 }
  0x31   :  { %1857 = vmatprep.mubr.msk.f32.mxu0 %vm63_vm0, %v45_v32 }
  0x34   :  { %1858 = vmatmul.mubr.msk.f32.gmra.mxu0 %vm63_vm0, %v46_v33 }
  0xd4   :  { %v1835_v34 = vpop.f32.mrf.mxu0  ;;  %v2042_v35 = vpop.f32.mrf.mxu1 }
  0xd6   :  { %v226_v36 = vpop.f32.mrf.mxu0  ;;  %v2044_v37 = vpop.f32.mrf.mxu1 }
  0xd8   :  { %v1838_v38 = vpop.f32.mrf.mxu0  ;;  %v2046_v39 = vpop.f32.mrf.mxu1 }
  0xda   :  { %v236_v40 = vpop.f32.mrf.mxu0  ;;  %v2048_v41 = vpop.f32.mrf.mxu1 }
  0xdc   :  { %v1841_v45 = vpop.f32.mrf.mxu0  ;;  %v1868_v46 = vpop.f32.mrf.mxu1 }
  0xdd   :  { %v657_v57 = vcombine.low %v1835_v34, %v1841_v45  ;;  %v658_v2 = vcombine.high %v1835_v34, %v1841_v45  ;;  %v809_v17 = vcombine.low %v2042_v35, %v1868_v46  ;;  %v810_v19 = vcombine.high %v2042_v35, %v1868_v46 }
  0xde   :  { %v246_v49 = vpop.f32.mrf.mxu0  ;;  %v336_v50 = vpop.f32.mrf.mxu1 }
  0xdf   :  { %v665_v4 = vrot.slane %v657_v57, %v2052_v56  ;;  %v385_v5 = vcombine.low %v226_v36, %v246_v49  ;;  %v386_v8 = vcombine.high %v226_v36, %v246_v49  ;;  %v672_v16 = vrot.slane %v658_v2, %v2052_v56 }
  0xe0   :  { %v1844_v51 = vpop.f32.mrf.mxu0  ;;  %v2050_v54 = vpop.f32.mrf.mxu1  ;;  %v537_v21 = vcombine.low %v2044_v37, %v336_v50  ;;  %v538_v25 = vcombine.high %v2044_v37, %v336_v50  ;;  %v2083_v34 = vrot.slane %v809_v17, %v2052_v56 }
  0xe1   :  { %v673_v55 = vcombine.low %v1838_v38, %v1844_v51  ;;  %v674_v60 = vcombine.high %v1838_v38, %v1844_v51  ;;  %v393_v20 = vrot.slane %v385_v5, %v2052_v56  ;;  %v400_v24 = vrot.slane %v386_v8, %v2052_v56 }
  0xe2   :  { %v256_v58 = vpop.f32.mrf.mxu0  ;;  %v2054_v59 = vpop.f32.mrf.mxu1  ;;  %v2091_v45 = vrot.slane %v537_v21, %v2052_v56  ;;  %v2094_v46 = vrot.slane %v538_v25, %v2052_v56 }
  0xe3   :  { %v681_v62 = vrot.slane %v673_v55, %v2052_v56  ;;  %v401_v63 = vcombine.low %v236_v40, %v256_v58  ;;  %v402_v3 = vcombine.high %v236_v40, %v256_v58  ;;  %v688_v9 = vrot.slane %v674_v60, %v2052_v56 }
  0xe4   :  { %v2057_v0 = vpop.f32.mrf.mxu0  ;;  %v1874_v1 = vpop.f32.mrf.mxu1  ;;  %v2087_v40 = vrot.slane %v810_v19, %v2052_v56 }
  0xe5   :  { %v721_v11 = vcombine.low %v665_v4, %v681_v62  ;;  %v722_v12 = vcombine.high %v665_v4, %v681_v62  ;;  %v409_v13 = vrot.slane %v401_v63, %v2052_v56  ;;  %v416_v18 = vrot.slane %v402_v3, %v2052_v56 }
  0xe6   :  { %v2060_v6 = vpop.f32.mrf.mxu0  ;;  %v2062_v7 = vpop.f32.mrf.mxu1  ;;  %v737_v26 = vcombine.low %v672_v16, %v688_v9  ;;  %v738_v27 = vcombine.high %v672_v16, %v688_v9 }
  0xe7   :  { %v729_v28 = vrot.slane %v721_v11, %v2065_v10  ;;  %v736_v29 = vrot.slane %v722_v12, %v2065_v10  ;;  %v449_v30 = vcombine.low %v393_v20, %v409_v13  ;;  %v450_v31 = vcombine.high %v393_v20, %v409_v13 }
  0xe8   :  { %v2068_v14 = vpop.f32.mrf.mxu0  ;;  %v1877_v15 = vpop.f32.mrf.mxu1  ;;  %v465_v35 = vcombine.low %v400_v24, %v416_v18  ;;  %v466_v36 = vcombine.high %v400_v24, %v416_v18  ;;  %v745_v47 = vrot.slane %v737_v26, %v2065_v10  ;;  %v752_v48 = vrot.slane %v738_v27, %v2065_v10 }
  0xe9   :  { %v825_v38 = vcombine.low %v2050_v54, %v1877_v15  ;;  %v826_v37 = vcombine.high %v2050_v54, %v1877_v15  ;;  %v2099_v50 = vrot.slane %v449_v30, %v2065_v10  ;;  %v2102_v51 = vrot.slane %v450_v31, %v2065_v10 }
  0xea   :  { %v2076_v22 = vpop.f32.mrf.mxu0  ;;  %v366_v23 = vpop.f32.mrf.mxu1  ;;  %v1767_v52 = vcombine.low %v729_v28, %v736_v29  ;;  %v1769_v53 = vcombine.high %v729_v28, %v736_v29  ;;  %v2105_v54 = vrot.slane %v465_v35, %v2065_v10  ;;  %v2108_v55 = vrot.slane %v466_v36, %v2065_v10 }
  0xeb   :  { %v833_v57 = vrot.slane %v825_v38, %v2052_v56  ;;  %v840_v60 = vrot.slane %v826_v37, %v2052_v56  ;;  %v553_v61 = vcombine.low %v2054_v59, %v366_v23  ;;  %v554_v2 = vcombine.high %v2054_v59, %v366_v23 }
  0xec   :  { %v1853_v32 = vpop.f32.mrf.mxu0  ;;  %v1880_v33 = vpop.f32.mrf.mxu1  ;;  %v1771_v4 = vcombine.low %v745_v47, %v752_v48  ;;  %v1773_v5 = vcombine.high %v745_v47, %v752_v48  ;;  %v1073_v11 = vrot.slane %v1767_v52, %v2052_v56  ;;  %v1089_v12 = vrot.slane %v1769_v53, %v2052_v56 }
  0xed   :  { %v841_v42 = vcombine.low %v1874_v1, %v1880_v33  ;;  %v842_v43 = vcombine.high %v1874_v1, %v1880_v33  ;;  %v689_v3 = vcombine.low %v2057_v0, %v1853_v32  ;;  %v690_v8 = vcombine.high %v2057_v0, %v1853_v32 }
  0xee   :  { %v286_v44 = vpop.f32.mrf.mxu0  ;;  %v376_v49 = vpop.f32.mrf.mxu1  ;;  %v561_v59 = vrot.slane %v553_v61, %v2052_v56  ;;  %v568_v0 = vrot.slane %v554_v2, %v2052_v56  ;;  %v1105_v21 = vrot.slane %v1771_v4, %v2052_v56  ;;  %v1121_v23 = vrot.slane %v1773_v5, %v2052_v56 }
  0xef   :  { %v849_v58 = vrot.slane %v841_v42, %v2052_v56  ;;  %v856_v62 = vrot.slane %v842_v43, %v2052_v56  ;;  %v569_v63 = vcombine.low %v2062_v7, %v376_v49  ;;  %v570_v9 = vcombine.high %v2062_v7, %v376_v49 }
  0xf0   :  { %v1856_v1 = vpop.f32.mrf.mxu0  ;;  %v417_v16 = vcombine.low %v2060_v6, %v286_v44  ;;  %v697_v7 = vrot.slane %v689_v3, %v2052_v56  ;;  %v704_v24 = vrot.slane %v690_v8, %v2052_v56  ;;  %v418_v25 = vcombine.high %v2060_v6, %v286_v44 }
  0xf1   :  { %v889_v13 = vcombine.low %v833_v57, %v849_v58  ;;  %v890_v15 = vcombine.high %v833_v57, %v849_v58  ;;  %v705_v17 = vcombine.low %v2068_v14, %v1856_v1  ;;  %v905_v18 = vcombine.low %v840_v60, %v856_v62 }
  0xf2   :  { %v906_v19 = vcombine.high %v840_v60, %v856_v62  ;;  %v577_v20 = vrot.slane %v569_v63, %v2052_v56  ;;  %v584_v26 = vrot.slane %v570_v9, %v2052_v56  ;;  %v706_v27 = vcombine.high %v2068_v14, %v1856_v1  ;;  %v296_v28 = vpop.f32.mrf.mxu0 }
  0xf3   :  { %v2135_v29 = vrot.slane %v889_v13, %v2065_v10  ;;  %v2138_v30 = vrot.slane %v890_v15, %v2065_v10  ;;  %v425_v31 = vrot.slane %v417_v16, %v2052_v56  ;;  %v713_v32 = vrot.slane %v705_v17, %v2052_v56 }
  0xf4   :  { %v2143_v33 = vrot.slane %v905_v18, %v2065_v10  ;;  %v2146_v6 = vrot.slane %v906_v19, %v2065_v10  ;;  %v617_v35 = vcombine.low %v561_v59, %v577_v20  ;;  %v618_v36 = vcombine.high %v561_v59, %v577_v20  ;;  %v1859_v3 = vpop.f32.mrf.mxu0 }
  0xf5   :  { %v433_v14 = vcombine.low %v2076_v22, %v296_v28  ;;  %v434_v38 = vcombine.high %v2076_v22, %v296_v28  ;;  %v1130_v37 = vcombine.high %v1073_v11, %v1089_v12  ;;  %v1162_v42 = vcombine.high %v1105_v21, %v1121_v23 }
  0xf6   :  { %v432_v43 = vrot.slane %v418_v25, %v2052_v56  ;;  %v633_v44 = vcombine.low %v568_v0, %v584_v26  ;;  %v634_v47 = vcombine.high %v568_v0, %v584_v26  ;;  %v720_v48 = vrot.slane %v706_v27, %v2052_v56 }
  0xf7   :  { %v1784_v49 = vcombine.low %v2135_v29, %v2138_v30  ;;  %v1786_v52 = vcombine.high %v2135_v29, %v2138_v30  ;;  %v1144_v53 = vrot.slane %v1130_v37, %v2065_v10  ;;  %v1176_v57 = vrot.slane %v1162_v42, %v2065_v10 }
  0xf8   :  { %v1788_v22 = vcombine.low %v2143_v33, %v2146_v6  ;;  %v441_v58 = vrot.slane %v433_v14, %v2052_v56  ;;  %v1129_v60 = vcombine.low %v1073_v11, %v1089_v12  ;;  %v1161_v61 = vcombine.low %v1105_v21, %v1121_v23 }
  0xf9   :  { %v2162_v62 = vrot.slane %v617_v35, %v2065_v10  ;;  %v2165_v63 = vrot.slane %v618_v36, %v2065_v10  ;;  %v753_v1 = vcombine.low %v697_v7, %v713_v32  ;;  %v448_v2 = vrot.slane %v434_v38, %v2052_v56 }
  0xfa   :  { %v754_v4 = vcombine.high %v697_v7, %v713_v32  ;;  %v1196_v5 = vcombine.high %v1144_v53, %v1176_v57  ;;  %v2169_v8 = vrot.slane %v1129_v60, %v2065_v10  ;;  %v2172_v9 = vrot.slane %v1161_v61, %v2065_v10  ;;  %v306_v60 = vpop.f32.mrf.mxu0 }
  0xfb   :  { %v1790_v11 = vcombine.high %v2143_v33, %v2146_v6  ;;  %v2177_v12 = vrot.slane %v633_v44, %v2065_v10  ;;  %v769_v13 = vcombine.low %v704_v24, %v720_v48  ;;  %v770_v15 = vcombine.high %v704_v24, %v720_v48 }
  0xfc   :  { %v481_v16 = vcombine.low %v425_v31, %v441_v58  ;;  %1493 = vrot.lane.b32.xlu1 %v1196_v5, %s1963_s0  ;;  %v1194_v17 = vcombine.high %v2169_v8, %v2172_v9  ;;  %v1193_v59 = vcombine.low %v2169_v8, %v2172_v9  ;;  %v793_v18 = vcombine.low %v1859_v3, %v2046_v39 }
  0xfd   :  { %v2186_v19 = vrot.slane %v634_v47, %v2065_v10  ;;  %v482_v20 = vcombine.high %v425_v31, %v441_v58  ;;  %v497_v0 = vcombine.low %v432_v43, %v448_v2  ;;  %v498_v7 = vcombine.high %v432_v43, %v448_v2 }
  0xfe   :  { %v1776_v21 = vcombine.low %v2162_v62, %v2165_v63  ;;  %v1778_v23 = vcombine.high %v2162_v62, %v2165_v63  ;;  %v2193_v24 = vrot.slane %v753_v1, %v2065_v10  ;;  %v2196_v25 = vrot.slane %v754_v4, %v2065_v10  ;;  %1477 = vrot.lane.b32.xlu0 %v1194_v17, %s1960_s16 }
  0xff   :  { %v2200_v26 = vrot.slane %v769_v13, %v2065_v10  ;;  %v2203_v27 = vrot.slane %v770_v15, %v2065_v10  ;;  %v794_v28 = vcombine.high %v1859_v3, %v2046_v39  ;;  %v1759_v31 = vcombine.low %v2099_v50, %v2102_v51 }
 0x100   :  { %v2209_v32 = vrot.slane %v481_v16, %v2065_v10  ;;  %v2212_v35 = vrot.slane %v793_v18, %v2052_v56  ;;  %v1195_v36 = vcombine.low %v1144_v53, %v1176_v57  ;;  %v1761_v14 = vcombine.high %v2099_v50, %v2102_v51 }
 0x101   :  { %v2217_v38 = vrot.slane %v482_v20, %v2065_v10  ;;  %v2220_v37 = vrot.slane %v497_v0, %v2065_v10  ;;  %v2223_v39 = vrot.slane %v498_v7, %v2065_v10  ;;  %v1763_v42 = vcombine.low %v2105_v54, %v2108_v55 }
 0x102   :  { %v1780_v43 = vcombine.low %v2177_v12, %v2186_v19  ;;  %v1782_v44 = vcombine.high %v2177_v12, %v2186_v19  ;;  %v1768_v50 = vcombine.low %v2193_v24, %v2196_v25  ;;  %1485 = vrot.lane.b32.xlu0 %v1195_v36, %s1964_s1  ;;  %v937_v51 = vrot.slane %v1759_v31, %v2052_v56 }
 0x103   :  { %v1770_v47 = vcombine.high %v2193_v24, %v2196_v25  ;;  %v1772_v48 = vcombine.low %v2200_v26, %v2203_v27  ;;  %v1774_v53 = vcombine.high %v2200_v26, %v2203_v27  ;;  %v2242_v57 = vrot.slane %v794_v28, %v2052_v56 }
 0x104   :  { %v857_v58 = vcombine.low %v2212_v35, %v2083_v34  ;;  %v953_v61 = vrot.slane %v1761_v14, %v2052_v56  ;;  %v969_v62 = vrot.slane %v1763_v42, %v2052_v56  ;;  %v1765_v63 = vcombine.high %v2105_v54, %v2108_v55 }
 0x105   :  { %v1760_v1 = vcombine.low %v2209_v32, %v2217_v38  ;;  %v1762_v2 = vcombine.high %v2209_v32, %v2217_v38  ;;  %v1764_v3 = vcombine.low %v2220_v37, %v2223_v39  ;;  %v1352_v4 = vrot.slane %v1784_v49, %v2052_v56 }
 0x106   :  { %v985_v5 = vrot.slane %v1765_v63, %v2052_v56  ;;  %v993_v12 = vcombine.low %v937_v51, %v953_v61  ;;  %v994_v13 = vcombine.high %v937_v51, %v953_v61  ;;  %v1368_v54 = vrot.slane %v1786_v52, %v2052_v56 }
 0x107   :  { %v1766_v55 = vcombine.high %v2220_v37, %v2223_v39  ;;  %v858_v15 = vcombine.high %v2212_v35, %v2083_v34  ;;  %v521_v16 = vcombine.low %v306_v60, %v2048_v41  ;;  %v522_v17 = vcombine.high %v306_v60, %v2048_v41 }
 0x108   :  { %v2272_v49 = vrot.slane %v993_v12, %v2065_v10  ;;  %v1025_v18 = vcombine.low %v969_v62, %v985_v5  ;;  %v1008_v19 = vrot.slane %v994_v13, %v2065_v10  ;;  %v1026_v20 = vcombine.high %v969_v62, %v985_v5 }
 0x109   :  { %v1384_v29 = vrot.slane %v1788_v22, %v2052_v56  ;;  %v1400_v30 = vrot.slane %v1790_v11, %v2052_v56  ;;  %v1417_v52 = vcombine.low %v1352_v4, %v1368_v54  ;;  %v2284_v41 = vrot.slane %v1776_v21, %v2052_v56 }
 0x10a   :  { %v2287_v0 = vrot.slane %v1025_v18, %v2065_v10  ;;  %v1040_v7 = vrot.slane %v1026_v20, %v2065_v10  ;;  %v2291_v24 = vrot.slane %v1778_v23, %v2052_v56  ;;  %v2294_v25 = vrot.slane %v1780_v43, %v2052_v56 }
 0x10b   :  { %v873_v22 = vcombine.low %v2242_v57, %v2087_v40  ;;  %v1425_v33 = vrot.slane %v1417_v52, %v2065_v10  ;;  %v1449_v6 = vcombine.low %v1384_v29, %v1400_v30  ;;  %v2300_v11 = vrot.slane %v1782_v44, %v2052_v56 }
 0x10c   :  { %v874_v21 = vcombine.high %v2242_v57, %v2087_v40  ;;  %v1058_v26 = vcombine.high %v2272_v49, %v2287_v0  ;;  %v1057_v23 = vcombine.low %v2272_v49, %v2287_v0  ;;  %v1059_v27 = vcombine.low %v1008_v19, %v1040_v7 }
 0x10d   :  { %v529_v28 = vrot.slane %v521_v16, %v2052_v56  ;;  %v1457_v31 = vrot.slane %v1449_v6, %v2065_v10  ;;  %v1281_v32 = vcombine.low %v2284_v41, %v2291_v24  ;;  %v1313_v36 = vcombine.low %v2294_v25, %v2300_v11 }
 0x10e   :  { %v536_v14 = vrot.slane %v522_v17, %v2052_v56  ;;  %1475 = vrot.lane.b32.xlu1 %v1058_v26, %s1960_s16  ;;  %1483 = vrot.lane.b32.xlu0 %v1059_v27, %s1964_s1  ;;  %v1060_v40 = vcombine.high %v1008_v19, %v1040_v7  ;;  %v1418_v38 = vcombine.high %v1352_v4, %v1368_v54 }
 0x10f   :  { %v1469_v37 = vcombine.low %v1425_v33, %v1457_v31  ;;  %v1450_v39 = vcombine.high %v1384_v29, %v1400_v30  ;;  %v1080_v42 = vrot.slane %v1768_v50, %v2052_v56  ;;  %v1096_v43 = vrot.slane %v1770_v47, %v2052_v56 }
 0x110   :  { %v1289_v44 = vrot.slane %v1281_v32, %v2065_v10  ;;  %v1321_v51 = vrot.slane %v1313_v36, %v2065_v10  ;;  %v1112_v57 = vrot.slane %v1772_v48, %v2052_v56  ;;  %v1128_v60 = vrot.slane %v1774_v53, %v2052_v56 }
 0x111   :  { %v585_v61 = vcombine.low %v529_v28, %v2091_v45  ;;  %v586_v62 = vcombine.high %v529_v28, %v2091_v45  ;;  %v944_v63 = vrot.slane %v1760_v1, %v2052_v56  ;;  %v960_v4 = vrot.slane %v1762_v2, %v2052_v56 }
 0x112   :  { %v601_v50 = vcombine.low %v536_v14, %v2094_v46  ;;  %v602_v47 = vcombine.high %v536_v14, %v2094_v46  ;;  %1491 = vrot.lane.b32.xlu0 %v1060_v40, %s1963_s0  ;;  %1565 = vrot.lane.b32.xlu1 %v1469_v37, %s1965_s23  ;;  %v2331_v48 = vrot.slane %v1418_v38, %v2065_v10 }
 0x113   :  { %v1470_v53 = vcombine.high %v1425_v33, %v1457_v31  ;;  %v2334_v5 = vrot.slane %v1450_v39, %v2065_v10  ;;  %v976_v45 = vrot.slane %v1764_v3, %v2052_v56  ;;  %v992_v1 = vrot.slane %v1766_v55, %v2052_v56 }
 0x114   :  { %v1333_v2 = vcombine.low %v1289_v44, %v1321_v51  ;;  %v1145_v12 = vcombine.low %v1080_v42, %v1096_v43  ;;  %v1177_v13 = vcombine.low %v1112_v57, %v1128_v60  ;;  %v1009_v54 = vcombine.low %v944_v63, %v960_v4 }
 0x115   :  { %v865_v46 = vrot.slane %v857_v58, %v2065_v10  ;;  %v872_v16 = vrot.slane %v858_v15, %v2065_v10  ;;  %v881_v17 = vrot.slane %v873_v22, %v2065_v10  ;;  %v1041_v18 = vcombine.low %v976_v45, %v992_v1 }
 0x116   :  { %v888_v19 = vrot.slane %v874_v21, %v2065_v10  ;;  %v593_v3 = vrot.slane %v585_v61, %v2065_v10  ;;  %v600_v55 = vrot.slane %v586_v62, %v2065_v10  ;;  %1563 = vrot.lane.b32.xlu0 %v1333_v2, %s1965_s23  ;;  %1573 = vrot.lane.b32.xlu1 %v1470_v53, %s1966_s24 }
 0x117   :  { %v609_v20 = vrot.slane %v601_v50, %v2065_v10  ;;  %v616_v29 = vrot.slane %v602_v47, %v2065_v10  ;;  %v1334_v34 = vcombine.high %v1289_v44, %v1321_v51  ;;  %v1471_v35 = vcombine.low %v2331_v48, %v2334_v5 }
 0x118   :  { %v1153_v58 = vrot.slane %v1145_v12, %v2065_v10  ;;  %v1185_v15 = vrot.slane %v1177_v13, %v2065_v10  ;;  %v1017_v30 = vrot.slane %v1009_v54, %v2065_v10  ;;  %v1049_v52 = vrot.slane %v1041_v18, %v2065_v10 }
 0x119   :  { %v1783_v7 = vcombine.low %v865_v46, %v872_v16  ;;  %v1785_v22 = vcombine.high %v865_v46, %v872_v16  ;;  %v1146_v33 = vcombine.high %v1080_v42, %v1096_v43  ;;  %v1178_v6 = vcombine.high %v1112_v57, %v1128_v60 }
 0x11a   :  { %1571 = vrot.lane.b32.xlu0 %v1334_v34, %s1966_s24  ;;  %1581 = vrot.lane.b32.xlu1 %v1471_v35, %s1967_s25  ;;  %v1010_v21 = vcombine.high %v944_v63, %v960_v4  ;;  %v1042_v26 = vcombine.high %v976_v45, %v992_v1  ;;  %v1787_v27 = vcombine.low %v881_v17, %v888_v19 }
 0x11b   :  { %v1789_v28 = vcombine.high %v881_v17, %v888_v19  ;;  %v1775_v31 = vcombine.low %v593_v3, %v600_v55  ;;  %v1777_v32 = vcombine.high %v593_v3, %v600_v55  ;;  %v1779_v36 = vcombine.low %v609_v20, %v616_v29 }
 0x11c   :  { %v1781_v14 = vcombine.high %v609_v20, %v616_v29  ;;  %v1197_v40 = vcombine.low %v1153_v58, %v1185_v15  ;;  %v1061_v38 = vcombine.low %v1017_v30, %v1049_v52  ;;  %v1198_v37 = vcombine.high %v1153_v58, %v1185_v15 }
 0x11d   :  { %v1160_v39 = vrot.slane %v1146_v33, %v2065_v10  ;;  %v1345_v42 = vrot.slane %v1783_v7, %v2052_v56  ;;  %v1192_v43 = vrot.slane %v1178_v6, %v2065_v10  ;;  %v1024_v44 = vrot.slane %v1010_v21, %v2065_v10 }
 0x11e   :  { %1501 = vrot.lane.b32.xlu1 %v1197_v40, %s1968_s26  ;;  %1499 = vrot.lane.b32.xlu0 %v1061_v38, %s1968_s26  ;;  %v1056_v51 = vrot.slane %v1042_v26, %v2065_v10  ;;  %v1062_v57 = vcombine.high %v1017_v30, %v1049_v52  ;;  %v1361_v60 = vrot.slane %v1785_v22, %v2052_v56  ;;  %v1974_v22 = vmov 0.0  }
 0x11f   :  { %v1377_v61 = vrot.slane %v1787_v27, %v2052_v56  ;;  %v1393_v62 = vrot.slane %v1789_v28, %v2052_v56  ;;  %v1209_v63 = vrot.slane %v1775_v31, %v2052_v56  ;;  %v1225_v4 = vrot.slane %v1777_v32, %v2052_v56  ;;  %1881 = vmatprep.subr.mxu1 %v1974_v22 }
 0x120   :  { %v1241_v50 = vrot.slane %v1779_v36, %v2052_v56  ;;  %v1257_v47 = vrot.slane %v1781_v14, %v2052_v56  ;;  %v1199_v53 = vcombine.low %v1160_v39, %v1192_v43  ;;  %v1063_v45 = vcombine.low %v1024_v44, %v1056_v51  ;;  %1885 = vmatprep.mubr.msk.f32.mxu1 %vm1976_vm1, %v1974_v22 }
 0x121   :  { %v1401_v1 = vcombine.low %v1345_v42, %v1361_v60  ;;  %v1433_v2 = vcombine.low %v1377_v61, %v1393_v62  ;;  %v1265_v12 = vcombine.low %v1209_v63, %v1225_v4  ;;  %v1200_v54 = vcombine.high %v1160_v39, %v1192_v43 }
 0x122   :  { %1509 = vrot.lane.b32.xlu1 %v1198_v37, %s1969_s27  ;;  %1507 = vrot.lane.b32.xlu0 %v1062_v57, %s1969_s27  ;;  %v1297_v13 = vcombine.low %v1241_v50, %v1257_v47  ;;  %v1064_v46 = vcombine.high %v1024_v44, %v1056_v51  ;;  %v1402_v19 = vcombine.high %v1345_v42, %v1361_v60 }
 0x123   :  { %v1409_v16 = vrot.slane %v1401_v1, %v2065_v10  ;;  %v1441_v17 = vrot.slane %v1433_v2, %v2065_v10  ;;  %v1273_v56 = vrot.slane %v1265_v12, %v2065_v10  ;;  %v1434_v3 = vcombine.high %v1377_v61, %v1393_v62 }
 0x124   :  { %v1305_v18 = vrot.slane %v1297_v13, %v2065_v10  ;;  %v1266_v29 = vcombine.high %v1209_v63, %v1225_v4  ;;  %v1298_v34 = vcombine.high %v1241_v50, %v1257_v47  ;;  %v1416_v58 = vrot.slane %v1402_v19, %v2065_v10 }
 0x125   :  { %v1465_v55 = vcombine.low %v1409_v16, %v1441_v17  ;;  %v1466_v35 = vcombine.high %v1409_v16, %v1441_v17  ;;  %v1448_v30 = vrot.slane %v1434_v3, %v2065_v10  ;;  %v1282_v21 = vcombine.high %v2284_v41, %v2291_v24 }
 0x126   :  { %1517 = vrot.lane.b32.xlu1 %v1199_v53, %s1970_s28  ;;  %1515 = vrot.lane.b32.xlu0 %v1063_v45, %s1970_s28  ;;  %v1329_v20 = vcombine.low %v1273_v56, %v1305_v18  ;;  %v1330_v15 = vcombine.high %v1273_v56, %v1305_v18  ;;  %v1280_v52 = vrot.slane %v1266_v29, %v2065_v10 }
 0x127   :  { %v1312_v7 = vrot.slane %v1298_v34, %v2065_v10  ;;  %v1467_v33 = vcombine.low %v1416_v58, %v1448_v30  ;;  %v1314_v26 = vcombine.high %v2294_v25, %v2300_v11  ;;  %v1468_v27 = vcombine.high %v1416_v58, %v1448_v30 }
 0x128   :  { %v1296_v31 = vrot.slane %v1282_v21, %v2065_v10  ;;  %v1472_v41 = vcombine.high %v2331_v48, %v2334_v5 }
 0x129   :  { %v1331_v6 = vcombine.low %v1280_v52, %v1312_v7  ;;  %v1332_v28 = vcombine.high %v1280_v52, %v1312_v7  ;;  %v1328_v32 = vrot.slane %v1314_v26, %v2065_v10 }
 0x12a   :  { %1525 = vrot.lane.b32.xlu1 %v1200_v54, %s1971_s29  ;;  %1523 = vrot.lane.b32.xlu0 %v1064_v46, %s1971_s29 }
 0x12b   :  { %v1335_v24 = vcombine.low %v1296_v31, %v1328_v32  ;;  %v1336_v25 = vcombine.high %v1296_v31, %v1328_v32  ;;  %v1637_v32 = vld [vmem:[%s2405_s2] sm:$0xff] }
 0x12e   :  { %1533 = vrot.lane.b32.xlu1 %v1465_v55, %s1972_s30  ;;  %1531 = vrot.lane.b32.xlu0 %v1329_v20, %s1972_s30 }
 0x132   :  { %1541 = vrot.lane.b32.xlu1 %v1466_v35, %s1973_s4  ;;  %1539 = vrot.lane.b32.xlu0 %v1330_v15, %s1973_s4 }
 0x136   :  { %1549 = vrot.lane.b32.xlu1 %v1467_v33, %s1975_s5  ;;  %1547 = vrot.lane.b32.xlu0 %v1331_v6, %s1975_s5 }
 0x13a   :  { %1557 = vrot.lane.b32.xlu1 %v1468_v27, %s1977_s6  ;;  %1555 = vrot.lane.b32.xlu0 %v1332_v28, %s1977_s6 }
 0x13e   :  { %1589 = vrot.lane.b32.xlu1 %v1472_v41, %s1978_s7  ;;  %1579 = vrot.lane.b32.xlu0 %v1335_v24, %s1967_s25 }
 0x142   :  { %1587 = vrot.lane.b32.xlu1 %v1336_v25, %s1978_s7 }
 0x16e   :  { %v1494_v36 = vpop.permute.xlu1 %1493 }
 0x170   :  { %v1478_v11 = vpop.permute.xlu0 %1477 }
 0x171   :  { %v1595_v47 = vsel %vm1593_vm2, %v1193_v59, %v1478_v11 }
 0x174   :  { %v1486_v14 = vpop.permute.xlu0 %1485 }
 0x175   :  { %v1597_v53 = vsel %vm63_vm0, %v1595_v47, %v1486_v14 }
 0x176   :  { %v1600_v54 = vsel %vm1598_vm3, %v1597_v53, %v1494_v36 }
 0x180   :  { %v1476_v40 = vpop.permute.xlu1 %1475  ;;  %v1484_v38 = vpop.permute.xlu0 %1483 }
 0x181   :  { %v1594_v45 = vsel %vm1593_vm2, %v1057_v23, %v1476_v40 }
 0x182   :  { %v1596_v1 = vsel %vm63_vm0, %v1594_v45, %v1484_v38 }
 0x184   :  { %v1492_v37 = vpop.permute.xlu0 %1491  ;;  %v1566_v10 = vpop.permute.xlu1 %1565 }
 0x185   :  { %v1599_v13 = vsel %vm1598_vm3, %v1596_v1, %v1492_v37 }
 0x188   :  { %v1564_v39 = vpop.permute.xlu0 %1563  ;;  %v1574_v42 = vpop.permute.xlu1 %1573 }
 0x18c   :  { %v1572_v43 = vpop.permute.xlu0 %1571  ;;  %v1582_v44 = vpop.permute.xlu1 %1581 }
 0x190   :  { %v1502_v51 = vpop.permute.xlu1 %1501  ;;  %v1500_v48 = vpop.permute.xlu0 %1499 }
 0x191   :  { %v1603_v46 = vsel %vm1601_vm4, %v1600_v54, %v1502_v51  ;;  %v1602_v16 = vsel %vm1601_vm4, %v1599_v13, %v1500_v48 }
 0x194   :  { %v1510_v5 = vpop.permute.xlu1 %1509  ;;  %v1508_v57 = vpop.permute.xlu0 %1507 }
 0x195   :  { %v1606_v8 = vsel %vm1604_vm5, %v1603_v46, %v1510_v5  ;;  %v1605_v9 = vsel %vm1604_vm5, %v1602_v16, %v1508_v57 }
 0x198   :  { %v1518_v60 = vpop.permute.xlu1 %1517  ;;  %v1516_v61 = vpop.permute.xlu0 %1515 }
 0x199   :  { %v1609_v59 = vsel %vm1607_vm6, %v1606_v8, %v1518_v60  ;;  %v1608_v17 = vsel %vm1607_vm6, %v1605_v9, %v1516_v61 }
 0x19c   :  { %v1526_v62 = vpop.permute.xlu1 %1525  ;;  %v1524_v63 = vpop.permute.xlu0 %1523 }
 0x19d   :  { %v1612_v23 = vsel %vm1610_vm7, %v1609_v59, %v1526_v62  ;;  %v1611_v56 = vsel %vm1610_vm7, %v1608_v17, %v1524_v63 }
 0x1a0   :  { %v1534_v4 = vpop.permute.xlu1 %1533  ;;  %v1532_v50 = vpop.permute.xlu0 %1531 }
 0x1a1   :  { %v1615_v18 = vsel %vm1613_vm8, %v1612_v23, %v1534_v4  ;;  %v1614_v19 = vsel %vm1613_vm8, %v1611_v56, %v1532_v50 }
 0x1a4   :  { %v1542_v2 = vpop.permute.xlu1 %1541  ;;  %v1540_v12 = vpop.permute.xlu0 %1539 }
 0x1a5   :  { %v1618_v3 = vsel %vm1616_vm9, %v1615_v18, %v1542_v2  ;;  %v1617_v55 = vsel %vm1616_vm9, %v1614_v19, %v1540_v12 }
 0x1a8   :  { %v1550_v49 = vpop.permute.xlu1 %1549  ;;  %v1548_v0 = vpop.permute.xlu0 %1547 }
 0x1a9   :  { %v1621_v20 = vsel %vm1619_vm10, %v1618_v3, %v1550_v49  ;;  %v1620_v29 = vsel %vm1619_vm10, %v1617_v55, %v1548_v0 }
 0x1ac   :  { %v1558_v34 = vpop.permute.xlu1 %1557  ;;  %v1556_v35 = vpop.permute.xlu0 %1555 }
 0x1ad   :  { %v1624_v58 = vsel %vm1622_vm11, %v1621_v20, %v1558_v34  ;;  %v1623_v15 = vsel %vm1622_vm11, %v1620_v29, %v1556_v35 }
 0x1ae   :  { %v1627_v30 = vsel %vm1625_vm12, %v1624_v58, %v1566_v10  ;;  %v1626_v52 = vsel %vm1625_vm12, %v1623_v15, %v1564_v39 }
 0x1af   :  { %v1630_v7 = vsel %vm1628_vm13, %v1627_v30, %v1574_v42  ;;  %v1629_v26 = vsel %vm1628_vm13, %v1626_v52, %v1572_v43 }
 0x1b0   :  { %v1633_v33 = vsel %vm1631_vm14, %v1630_v7, %v1582_v44  ;;  %v1590_v6 = vpop.permute.xlu1 %1589  ;;  %v1580_v27 = vpop.permute.xlu0 %1579 }
 0x1b1   :  { %v1636_v21 = vsel %vm1634_vm15, %v1633_v33, %v1590_v6  ;;  %v1632_v28 = vsel %vm1631_vm14, %v1629_v26, %v1580_v27 }
 0x1b2   :  { %1882 = vmatpush3.msra.mxu1 %v1636_v21 }
 0x1b3   :  { %1883 = vmatprep.subr.mxu1 %v1974_v22 }
 0x1b4   :  { %v1588_v31 = vpop.permute.xlu1 %1587 }
 0x1b5   :  { %v1635_v41 = vsel %vm1634_vm15, %v1632_v28, %v1588_v31 }
 0x1b6   :  { %1884 = vmatpush3.msra.mxu1 %v1635_v41 }
 0x1b7   :  { %1886 = vmatmul.mubr.msk.f32.vlgmr.msra.gmra.mxu1 %vm63_vm0, %v1637_v32 }
 0x277   :  { %v1707_v24 = vpop.f32.mrf.mxu1 }
 0x278   :  { %1711 = vst [vmem:[#allocation5] sm:$0xff] %v1707_v24 }
 0x279   :  { %v1887_v25 = vpop.f32.mrf.mxu1 }
 0x27a   :  { %1945 = shalt.err (!%p1942_p9)
}
 0x27b   :  { %1721 = dma.vmem_to_hbm [thread:$0]  %s1719_s11, 128, %s2406_s3, [#allocation4]  }
 0x27c   :  { %1956 = dma.done.wait [#allocation4], 128  }
 0x27d   :  { %1957 = vsyncadd [#allocation4], 4294967168 }
 0x27e   :  { %1725 = vsyncpa [#allocation3], 1 }
 0x27f   :  { %1726 = vsyncpa [#allocation4], 1 }

</bundles_post_ra>
